<compile_context>
chip_gen: v5e
topology: v5e:2x2
jax: 0.10.0
libtpu: 0.0.40
codegen_flags: <defaults>
</compile_context>

<pallas_src>
import functools

import jax
import jax.numpy as jnp
from jax import lax
from jax.experimental import pallas as pl
from jax.experimental.pallas import tpu as pltpu

_NEG_BIG = -1e30  # finite "masked" logit; exp(_NEG_BIG - m) underflows to exactly 0


# --------------------------------------------------------------------------------------------
# Kernel
# --------------------------------------------------------------------------------------------
def _cab_kernel(q_ref, kp_ref, v_ref,
                wq_ref, bq_ref, g_ref, beta_ref, w1_ref, b1_ref, w2_ref, b2_ref,
                o_ref,
                m_s, l_s, acc_s, qp_s, vres_s,
                *, eps, blq, blk, l_valid, mask_keys):
    """One grid step = (batch b, q-tile iq, kv-tile ik).  Blocks are channels-first (D, Ltile)."""
    iq = pl.program_id(1)
    ik = pl.program_id(2)

    @pl.when(ik == 0)
    def _init():
        m_s[...] = jnp.full_like(m_s, -jnp.inf)          # running max       (1, blq)
        l_s[...] = jnp.zeros_like(l_s)                   # running sum       (1, blq)
        acc_s[...] = jnp.zeros_like(acc_s)               # numerator         (D, blq)
        # q projection depends only on (b, iq): compute once per q tile, cache as bf16 so the
        # per-kv-step scores matmul has bf16 MXU operands.  Scale already folded into wq/bq.
        qp = jnp.dot(wq_ref[...], q_ref[0],
                     preferred_element_type=jnp.float32) + bq_ref[...]      # (I, blq) f32
        qp_s[...] = qp.astype(jnp.bfloat16)

    # Snapshot the residual-v tile (query positions) from the kv stream instead of a second,
    # duplicated HBM stream.  Tile selection guarantees blk % blq == 0, so the q-tile range is
    # fully contained in exactly one kv tile.  Every kv tile has >=1 valid key (pad < 128 <= blk)
    # so the online-softmax recurrence below never sees an all-masked tile.
    if blk == blq:
        @pl.when(ik == iq)
        def _snap():
            vres_s[...] = v_ref[0]
    else:
        @pl.when(ik == (iq * blq) // blk)
        def _snap():
            off = pl.multiple_of((iq * blq) % blk, 128)
            vres_s[...] = v_ref[0, :, pl.ds(off, blq)]

    # Scores with keys on sublanes, queries on lanes: (blk, blq).  bf16 x bf16 -> f32 acc.
    kp = kp_ref[0]                                        # (I, blk) bf16 (precomputed wk@k+bk)
    s = lax.dot_general(kp, qp_s[...], (((0,), (0,)), ((), ())),
                        preferred_element_type=jnp.float32)
    if mask_keys:
        key_pos = lax.broadcasted_iota(jnp.int32, (blk, blq), 0) + ik * blk
        s = jnp.where(key_pos < l_valid, s, _NEG_BIG)     # mask padded key positions

    # Online softmax over the key axis (axis 0).
    m_prev = m_s[...]
    m_new = jnp.maximum(m_prev, jnp.max(s, axis=0, keepdims=True))   # (1, blq)
    alpha = jnp.exp(m_prev - m_new)                                  # (1, blq)
    p = jnp.exp(s - m_new)                                           # (blk, blq)
    l_s[...] = alpha * l_s[...] + jnp.sum(p, axis=0, keepdims=True)
    # Attention numerator in channels-first layout: (D, blk) @ (blk, blq) -> (D, blq).
    acc_s[...] = alpha * acc_s[...] + jnp.dot(v_ref[0], p.astype(jnp.bfloat16),
                                              preferred_element_type=jnp.float32)
    m_s[...] = m_new

    @pl.when(ik == pl.num_programs(2) - 1)
    def _finalize():
        # Exact final 1/l normalization ((1, blq) -> negligible cost, tighter accuracy).
        inv_l = 1.0 / l_s[...]
        attn = acc_s[...] * inv_l                                    # (D, blq)
        # Residual 1 (RAW v at query positions, as in the reference forward).
        v1 = vres_s[...].astype(jnp.float32) + attn                  # (D, blq) f32

        # LayerNorm over d_model (axis 0 in channels-first layout), biased var, eps=1e-5.
        mean = jnp.mean(v1, axis=0, keepdims=True)
        cen = v1 - mean
        var = jnp.mean(cen * cen, axis=0, keepdims=True)
        vn = cen * lax.rsqrt(var + eps) * g_ref[...] + beta_ref[...]

        # MLP: Linear -> exact GELU (erf) -> Linear, channels-first.
        # (If bundle dumps show vld/vst pressure here, split this epilogue over blq chunks.)
        h = jnp.dot(w1_ref[...], vn.astype(jnp.bfloat16),
                    preferred_element_type=jnp.float32) + b1_ref[...]     # (F, blq)
        h = 0.5 * h * (1.0 + lax.erf(h * 0.7071067811865476))
        mlp = jnp.dot(w2_ref[...], h.astype(jnp.bfloat16),
                      preferred_element_type=jnp.float32) + b2_ref[...]   # (D, blq)

        # Residual 2; store directly in (B, d_model, L) layout.
        o_ref[0] = (v1 + mlp).astype(o_ref.dtype)


# --------------------------------------------------------------------------------------------
# Tile / VMEM sizing
# --------------------------------------------------------------------------------------------
def _vmem_need_bytes(D, I, F, blq, blk):
    """Conservative VMEM estimate: double-buffered streams + double-buffered weights + scratch."""
    streams = 2 * (D * blq * 2 + I * blk * 2 + D * blk * 2 + D * blq * 4)   # q, kp, v (bf16), out (f32)
    weights = 2 * ((I * D + 2 * D * F) * 2 + (I + F + 3 * D) * 4)           # bf16 mats + f32 vecs
    scratch = 2 * blq * 4 + D * blq * 4 + I * blq * 2 + D * blq * 2         # m, l, acc, qp, vres
    return streams + weights + scratch


def _choose_tiles(B, D, I, F, Lp, budget):
    """Pick (blq, blk).  256-multiples preferred (v6e/v7x MXU is 256-wide); blk is a multiple of
    blq (residual snapshot alignment) grown as large as the VMEM budget allows (nk==1 collapses
    the kv axis entirely when K+V fit)."""
    blq = 256 if (Lp % 256 == 0 and _vmem_need_bytes(D, I, F, 256, 256) <= budget) else 128
    blq = min(blq, Lp)
    # v7x has 2 TensorCores: keep the parallel grid axes (B, nq) at >= 2 total iterations.
    if B * (Lp // blq) < 2 and Lp // 128 >= 2:
        blq = (Lp // 2) // 128 * 128
        while Lp % blq:
            blq -= 128
    blk = blq
    for m in range(min(Lp // blq, max(1, 2048 // blq)), 0, -1):
        cand = m * blq
        if Lp % cand == 0 and _vmem_need_bytes(D, I, F, blq, cand) <= budget:
            blk = cand
            break
    return blq, blk


# --------------------------------------------------------------------------------------------
# Wrapper
# --------------------------------------------------------------------------------------------
def cross_attention_block(q, k, v, kparams):
    """q, k, v: (B, d_model, L) float32 (PyTorch layout).  Returns (B, d_model, L) float32."""
    B, D, L = q.shape
    (wq, bq, wk, bk, gamma, beta, w1, b1, w2, b2) = kparams
    di = wq.shape[0]       # inner dim = d_model // 8
    dff = w1.shape[0]      # feed-forward width (= d_model in this module)

    # Pad L to a lane-dense multiple of 128; padded keys are masked in-kernel, padded query
    # columns are sliced off after the call.
    Lp = ((L + 127) // 128) * 128
    pad = Lp - L
    mask_keys = pad > 0

    # Per-generation VMEM capacity (64 MiB/TC on v7x, 128 MiB on v5e/v6e).
    try:
        vmem_cap = int(pltpu.get_tpu_info().vmem_capacity_bytes)
    except Exception:  # pragma: no cover - conservative fallback
        vmem_cap = 64 * 2**20

    blq, blk = _choose_tiles(B, D, di, dff, Lp, int(0.8 * vmem_cap))
    nq, nk = Lp // blq, Lp // blk

    # Wrapper-side prep (one pass each over small tensors):
    #   * precompute kp = wk @ k + bk once per batch (tiny (B, I, L) bf16) -> stream kp, not k
    #   * cast q and kv-side v to bf16 (they are consumed only as bf16 MXU operands)
    qb, vb = q, v
    if pad:
        qb = jnp.pad(qb, ((0, 0), (0, 0), (0, pad)))
        vb = jnp.pad(vb, ((0, 0), (0, 0), (0, pad)))
    qb = qb.astype(jnp.bfloat16)
    vb = vb.astype(jnp.bfloat16)
    kp = (jnp.einsum("id,bdl->bil", wk, k) + bk[None, :, None]).astype(jnp.bfloat16)
    if pad:
        kp = jnp.pad(kp, ((0, 0), (0, 0), (0, pad)))

    q_spec = pl.BlockSpec((1, D, blq), lambda b_, iq, ik: (b_, 0, iq))
    kp_spec = pl.BlockSpec((1, di, blk), lambda b_, iq, ik: (b_, 0, ik))
    v_spec = pl.BlockSpec((1, D, blk), lambda b_, iq, ik: (b_, 0, ik))
    out_spec = pl.BlockSpec((1, D, blq), lambda b_, iq, ik: (b_, 0, iq))

    def full_spec(arr):
        nd = arr.ndim
        return pl.BlockSpec(arr.shape, lambda b_, iq, ik, _nd=nd: (0,) * _nd)

    kernel = functools.partial(_cab_kernel, eps=1e-5, blq=blq, blk=blk,
                               l_valid=L, mask_keys=mask_keys)

    # Advisory cost estimate for XLA's scheduler (kernel-side work only).
    flops = 2 * B * (Lp * D * di + Lp * Lp * di + Lp * Lp * D + 2 * Lp * D * dff)
    transcendentals = B * (Lp * Lp + Lp * dff + Lp)
    bytes_accessed = (B * nq * (di + D) * Lp * 2          # kp + v re-read once per q tile
                      + B * D * Lp * 2                    # q (bf16)
                      + B * D * Lp * 4                    # output (f32)
                      + (di * D + 2 * D * dff) * 2 + (di + dff + 3 * D) * 4)
    cost = pl.CostEstimate(flops=int(flops), transcendentals=int(transcendentals),
                           bytes_accessed=int(bytes_accessed))

    need = _vmem_need_bytes(D, di, dff, blq, blk)
    vmem_limit = int(min(0.85 * vmem_cap, max(16 * 2**20, 1.4 * need + (2 << 20))))

    out = pl.pallas_call(
        kernel,
        out_shape=jax.ShapeDtypeStruct((B, D, Lp), jnp.float32),
        grid_spec=pltpu.PrefetchScalarGridSpec(
            num_scalar_prefetch=0,
            grid=(B, nq, nk),
            in_specs=[
                q_spec,                 # q   (bf16, kv-invariant -> fetched once per q tile)
                kp_spec, v_spec,        # kp, v (bf16 kv stream)
                full_spec(wq), full_spec(bq),
                full_spec(gamma), full_spec(beta),
                full_spec(w1), full_spec(b1),
                full_spec(w2), full_spec(b2),
            ],
            out_specs=out_spec,
            scratch_shapes=[
                pltpu.VMEM((1, blq), jnp.float32),     # running max
                pltpu.VMEM((1, blq), jnp.float32),     # running sum
                pltpu.VMEM((D, blq), jnp.float32),     # attention numerator
                pltpu.VMEM((di, blq), jnp.bfloat16),   # cached q projection (bf16 MXU operand)
                pltpu.VMEM((D, blq), jnp.bfloat16),    # residual-v snapshot
            ],
        ),
        compiler_params=pltpu.CompilerParams(
            dimension_semantics=("parallel", "parallel", "arbitrary"),
            vmem_limit_bytes=vmem_limit,
        ),
        cost_estimate=cost,
    )(qb, kp, vb, wq, bq, gamma, beta, w1, b1, w2, b2)

    if pad:
        out = out[:, :, :L]
    return out


# --------------------------------------------------------------------------------------------
# Parameters
# --------------------------------------------------------------------------------------------
def init_params(key, d_model):
    """Raw parameters in PyTorch nn.Linear orientation (out_features, in_features)."""
    inner = d_model // 8
    d_ff = d_model                      # FeedForward(d_model, d_model) in CrossAttentionBlock
    ks = jax.random.split(key, 8)
    s = 0.02
    wq = jax.random.normal(ks[0], (inner, d_model), jnp.float32) * s
    bq = jax.random.normal(ks[1], (inner,), jnp.float32) * s
    wk = jax.random.normal(ks[2], (inner, d_model), jnp.float32) * s
    bk = jax.random.normal(ks[3], (inner,), jnp.float32) * s
    gamma = jnp.ones((d_model,), jnp.float32)
    beta = jnp.zeros((d_model,), jnp.float32)
    w1 = jax.random.normal(ks[4], (d_ff, d_model), jnp.float32) * s
    b1 = jax.random.normal(ks[5], (d_ff,), jnp.float32) * s
    w2 = jax.random.normal(ks[6], (d_model, d_ff), jnp.float32) * s
    b2 = jax.random.normal(ks[7], (d_model,), jnp.float32) * s
    # TODO(synk): wv (nn.Linear(d_model, d_model)) and norm2 are defined in __init__ but never
    # used in the reference forward pass, so they are intentionally not materialized here.
    return (wq, bq, wk, bk, gamma, beta, w1, b1, w2, b2)


def prepare_params(raw):
    """One-time transform: fold softmax scale into wq/bq, cast MXU weights to bf16, reshape
    biases/LN params to column vectors.  wk/bk stay f32: they are consumed in the wrapper's
    per-batch kp pre-projection, not in the kernel."""
    (wq, bq, wk, bk, gamma, beta, w1, b1, w2, b2) = raw
    inner = wq.shape[0]
    scale = 1.0 / float(inner) ** 0.5          # from the TRUE inner size (d_model // 8)
    return (
        (wq * scale).astype(jnp.bfloat16),                     # (I, D)  kernel
        (bq * scale).reshape(inner, 1).astype(jnp.float32),    # (I, 1)  kernel
        wk.astype(jnp.float32),                                # (I, D)  wrapper (kp precompute)
        bk.astype(jnp.float32),                                # (I,)    wrapper
        gamma.reshape(-1, 1).astype(jnp.float32),              # (D, 1)
        beta.reshape(-1, 1).astype(jnp.float32),               # (D, 1)
        w1.astype(jnp.bfloat16),                               # (F, D)
        b1.reshape(-1, 1).astype(jnp.float32),                 # (F, 1)
        w2.astype(jnp.bfloat16),                               # (D, F)
        b2.reshape(-1, 1).astype(jnp.float32),                 # (D, 1)
    )


# --------------------------------------------------------------------------------------------
# Plain-JAX reference (mirrors the PyTorch forward with the raw f32 params)
# --------------------------------------------------------------------------------------------
def _reference_jax(q, k, v, raw):
    (wq, bq, wk, bk, gamma, beta, w1, b1, w2, b2) = raw
    inner = wq.shape[0]
    qT = jnp.transpose(q, (0, 2, 1))
    kT = jnp.transpose(k, (0, 2, 1))
    vT = jnp.transpose(v, (0, 2, 1))
    qp = qT @ wq.T + bq
    kp = kT @ wk.T + bk
    sims = jnp.einsum("bld,bmd->blm", qp, kp) / (inner ** 0.5)
    attw = jax.nn.softmax(sims, axis=-1)
    attn = jnp.einsum("blm,bmd->bld", attw, vT)
    v1 = vT + attn
    mean = jnp.mean(v1, axis=-1, keepdims=True)
    var = jnp.mean((v1 - mean) ** 2, axis=-1, keepdims=True)
    vn = (v1 - mean) / jnp.sqrt(var + 1e-5) * gamma + beta
    h = jax.nn.gelu(vn @ w1.T + b1, approximate=False)
    out = v1 + (h @ w2.T + b2)
    return jnp.transpose(out, (0, 2, 1))


if __name__ == "__main__":
    B, d_model, num_heads, L = 2, 32, 4, 8
    assert d_model % num_heads == 0

    key = jax.random.PRNGKey(0)
    kq, kk, kv, kp_ = jax.random.split(key, 4)
    # PyTorch layout: (B, d_model, L)
    q = jax.random.normal(kq, (B, d_model, L), jnp.float32)
    k = jax.random.normal(kk, (B, d_model, L), jnp.float32)
    v = jax.random.normal(kv, (B, d_model, L), jnp.float32)

    raw_params = init_params(kp_, d_model)
    kparams = prepare_params(raw_params)

    out = jax.block_until_ready(cross_attention_block(q, k, v, kparams))
    ref = jax.block_until_ready(_reference_jax(q, k, v, raw_params))

    assert out.shape == (B, d_model, L)
    err = float(jnp.max(jnp.abs(out - ref)))
    # bf16 MXU operands / bf16 activation streams -> looser tolerance than a pure-f32 kernel.
    assert err < 5e-2, f"mismatch vs plain-JAX reference: {err}"
    print("KERNEL_OK")
</pallas_src>

<mosaic_0001>
module attributes {stable_mosaic.version = 11 : i64} {
  func.func @_cab_kernel(%arg0: i32, %arg1: i32, %arg2: i32, %arg3: memref<1x32x128xbf16, #tpu.memory_space<vmem>>, %arg4: memref<1x4x128xbf16, #tpu.memory_space<vmem>>, %arg5: memref<1x32x128xbf16, #tpu.memory_space<vmem>>, %arg6: memref<4x32xbf16, #tpu.memory_space<vmem>>, %arg7: memref<4x1xf32, #tpu.memory_space<vmem>>, %arg8: memref<32x1xf32, #tpu.memory_space<vmem>>, %arg9: memref<32x1xf32, #tpu.memory_space<vmem>>, %arg10: memref<32x32xbf16, #tpu.memory_space<vmem>>, %arg11: memref<32x1xf32, #tpu.memory_space<vmem>>, %arg12: memref<32x32xbf16, #tpu.memory_space<vmem>>, %arg13: memref<32x1xf32, #tpu.memory_space<vmem>>, %arg14: memref<1x32x128xf32, #tpu.memory_space<vmem>>, %arg15: memref<1x128xf32, #tpu.memory_space<vmem>>, %arg16: memref<1x128xf32, #tpu.memory_space<vmem>>, %arg17: memref<32x128xf32, #tpu.memory_space<vmem>>, %arg18: memref<4x128xbf16, #tpu.memory_space<vmem>>, %arg19: memref<32x128xbf16, #tpu.memory_space<vmem>>) attributes {dimension_semantics = [#tpu.dimension_semantics<parallel>, #tpu.dimension_semantics<parallel>, #tpu.dimension_semantics<arbitrary>], iteration_bounds = array<i64: 2, 1, 1>, scalar_prefetch = 0 : i64, scratch_operands = 5 : i64, tpu.core_type = #tpu.core_type<tc>, window_params = [{transform_indices = @transform_0, window_bounds = array<i64: 1, 32, 128>}, {transform_indices = @transform_1, window_bounds = array<i64: 1, 4, 128>}, {transform_indices = @transform_2, window_bounds = array<i64: 1, 32, 128>}, {pipeline_mode = #tpu.pipeline_mode<synchronous>, transform_indices = @transform_3, window_bounds = array<i64: 4, 32>}, {pipeline_mode = #tpu.pipeline_mode<synchronous>, transform_indices = @transform_4, window_bounds = array<i64: 4, 1>}, {pipeline_mode = #tpu.pipeline_mode<synchronous>, transform_indices = @transform_5, window_bounds = array<i64: 32, 1>}, {pipeline_mode = #tpu.pipeline_mode<synchronous>, transform_indices = @transform_6, window_bounds = array<i64: 32, 1>}, {pipeline_mode = #tpu.pipeline_mode<synchronous>, transform_indices = @transform_7, window_bounds = array<i64: 32, 32>}, {pipeline_mode = #tpu.pipeline_mode<synchronous>, transform_indices = @transform_8, window_bounds = array<i64: 32, 1>}, {pipeline_mode = #tpu.pipeline_mode<synchronous>, transform_indices = @transform_9, window_bounds = array<i64: 32, 32>}, {pipeline_mode = #tpu.pipeline_mode<synchronous>, transform_indices = @transform_10, window_bounds = array<i64: 32, 1>}, {transform_indices = @transform_11, window_bounds = array<i64: 1, 32, 128>}]} {
    %c0_i32 = arith.constant 0 : i32
    %0 = arith.cmpi eq, %arg2, %c0_i32 : i32
    %1 = arith.extui %0 : i1 to i32
    %c0_i32_0 = arith.constant 0 : i32
    %2 = arith.cmpi ne, %1, %c0_i32_0 : i32
    scf.if %2 {
      %cst_27 = arith.constant 0xFF800000 : f32
      %46 = vector.broadcast %cst_27 : f32 to vector<1x128xf32>
      %c0_28 = arith.constant 0 : index
      %c0_29 = arith.constant 0 : index
      %47 = vector.load %arg15[%c0_28, %c0_29] : memref<1x128xf32, #tpu.memory_space<vmem>>, vector<1x128xf32>
      tpu.vector_store %arg15[%c0_28, %c0_29], %46 {strides = array<i32>} : memref<1x128xf32, #tpu.memory_space<vmem>>, vector<1x128xf32>,
      %cst_30 = arith.constant 0.000000e+00 : f32
      %48 = vector.broadcast %cst_30 : f32 to vector<1x128xf32>
      %c0_31 = arith.constant 0 : index
      %c0_32 = arith.constant 0 : index
      %49 = vector.load %arg16[%c0_31, %c0_32] : memref<1x128xf32, #tpu.memory_space<vmem>>, vector<1x128xf32>
      tpu.vector_store %arg16[%c0_31, %c0_32], %48 {strides = array<i32>} : memref<1x128xf32, #tpu.memory_space<vmem>>, vector<1x128xf32>,
      %cst_33 = arith.constant 0.000000e+00 : f32
      %50 = vector.broadcast %cst_33 : f32 to vector<32x128xf32>
      %c0_34 = arith.constant 0 : index
      %c0_35 = arith.constant 0 : index
      %51 = vector.load %arg17[%c0_34, %c0_35] : memref<32x128xf32, #tpu.memory_space<vmem>>, vector<32x128xf32>
      tpu.vector_store %arg17[%c0_34, %c0_35], %50 {strides = array<i32>} : memref<32x128xf32, #tpu.memory_space<vmem>>, vector<32x128xf32>,
      %c0_36 = arith.constant 0 : index
      %c0_37 = arith.constant 0 : index
      %52 = vector.load %arg6[%c0_36, %c0_37] : memref<4x32xbf16, #tpu.memory_space<vmem>>, vector<4x32xbf16>
      %c0_38 = arith.constant 0 : index
      %c0_39 = arith.constant 0 : index
      %c0_40 = arith.constant 0 : index
      %53 = vector.load %arg3[%c0_38, %c0_39, %c0_40] : memref<1x32x128xbf16, #tpu.memory_space<vmem>>, vector<1x32x128xbf16>
      %54 = vector.shape_cast %53 : vector<1x32x128xbf16> to vector<32x128xbf16>
      %cst_41 = arith.constant dense<0.000000e+00> : vector<4x128xf32>
      %55 = tpu.matmul %52, %54, %cst_41 {dimension_numbers = #tpu.dot_dimension_numbers<[1], [0], [0], [1], [0, 0, 1, 1], [], []>} : vector<4x32xbf16>, vector<32x128xbf16>, vector<4x128xf32> -> vector<4x128xf32>
      %c0_42 = arith.constant 0 : index
      %c0_43 = arith.constant 0 : index
      %56 = vector.load %arg7[%c0_42, %c0_43] : memref<4x1xf32, #tpu.memory_space<vmem>>, vector<4x1xf32>
      %57 = vector.broadcast %56 : vector<4x1xf32> to vector<4x128xf32>
      %58 = arith.addf %55, %57 : vector<4x128xf32>
      %59 = arith.truncf %58 : vector<4x128xf32> to vector<4x128xbf16>
      %c0_44 = arith.constant 0 : index
      %c0_45 = arith.constant 0 : index
      %60 = vector.load %arg18[%c0_44, %c0_45] : memref<4x128xbf16, #tpu.memory_space<vmem>>, vector<4x128xbf16>
      tpu.vector_store %arg18[%c0_44, %c0_45], %59 {strides = array<i32>} : memref<4x128xbf16, #tpu.memory_space<vmem>>, vector<4x128xbf16>,
    } else {
    }
    %3 = arith.cmpi eq, %arg2, %arg1 : i32
    %4 = arith.extui %3 : i1 to i32
    %c0_i32_1 = arith.constant 0 : i32
    %5 = arith.cmpi ne, %4, %c0_i32_1 : i32
    scf.if %5 {
      %c0_27 = arith.constant 0 : index
      %c0_28 = arith.constant 0 : index
      %c0_29 = arith.constant 0 : index
      %46 = vector.load %arg5[%c0_27, %c0_28, %c0_29] : memref<1x32x128xbf16, #tpu.memory_space<vmem>>, vector<1x32x128xbf16>
      %47 = vector.shape_cast %46 : vector<1x32x128xbf16> to vector<32x128xbf16>
      %c0_30 = arith.constant 0 : index
      %c0_31 = arith.constant 0 : index
      %48 = vector.load %arg19[%c0_30, %c0_31] : memref<32x128xbf16, #tpu.memory_space<vmem>>, vector<32x128xbf16>
      tpu.vector_store %arg19[%c0_30, %c0_31], %47 {strides = array<i32>} : memref<32x128xbf16, #tpu.memory_space<vmem>>, vector<32x128xbf16>,
    } else {
    }
    %c0 = arith.constant 0 : index
    %c0_2 = arith.constant 0 : index
    %c0_3 = arith.constant 0 : index
    %6 = vector.load %arg4[%c0, %c0_2, %c0_3] : memref<1x4x128xbf16, #tpu.memory_space<vmem>>, vector<1x4x128xbf16>
    %7 = vector.shape_cast %6 : vector<1x4x128xbf16> to vector<4x128xbf16>
    %c0_4 = arith.constant 0 : index
    %c0_5 = arith.constant 0 : index
    %8 = vector.load %arg18[%c0_4, %c0_5] : memref<4x128xbf16, #tpu.memory_space<vmem>>, vector<4x128xbf16>
    %cst = arith.constant dense<0.000000e+00> : vector<128x128xf32>
    %9 = tpu.matmul %7, %8, %cst {dimension_numbers = #tpu.dot_dimension_numbers<[0], [0], [1], [1], [0, 1, 1, 1], [], []>} : vector<4x128xbf16>, vector<4x128xbf16>, vector<128x128xf32> -> vector<128x128xf32>
    %10 = tpu.iota {dimensions = array<i32: 0>} : vector<128x128xi32>
    %c128_i32 = arith.constant 128 : i32
    %11 = arith.muli %arg2, %c128_i32 : i32
    %12 = vector.broadcast %11 : i32 to vector<128x128xi32>
    %13 = arith.addi %10, %12 : vector<128x128xi32>
    %c8_i32 = arith.constant 8 : i32
    %14 = vector.broadcast %c8_i32 : i32 to vector<128x128xi32>
    %15 = arith.cmpi slt, %13, %14 : vector<128x128xi32>
    %cst_6 = arith.constant -1.000000e+30 : f32
    %16 = vector.broadcast %cst_6 : f32 to vector<128x128xf32>
    %17 = arith.select %15, %9, %16 : vector<128x128xi1>, vector<128x128xf32>
    %c0_7 = arith.constant 0 : index
    %c0_8 = arith.constant 0 : index
    %18 = vector.load %arg15[%c0_7, %c0_8] : memref<1x128xf32, #tpu.memory_space<vmem>>, vector<1x128xf32>
    %cst_9 = arith.constant dense<0xFF800000> : vector<128xf32>
    %19 = vector.multi_reduction <maximumf>, %17, %cst_9 [0] : vector<128x128xf32> to vector<128xf32>
    %20 = vector.shape_cast %19 : vector<128xf32> to vector<1x128xf32>
    %21 = arith.maximumf %18, %20 : vector<1x128xf32>
    %22 = arith.subf %18, %21 : vector<1x128xf32>
    %23 = math.exp %22 : vector<1x128xf32>
    %24 = vector.broadcast %21 : vector<1x128xf32> to vector<128x128xf32>
    %25 = arith.subf %17, %24 : vector<128x128xf32>
    %26 = math.exp %25 : vector<128x128xf32>
    %c0_10 = arith.constant 0 : index
    %c0_11 = arith.constant 0 : index
    %27 = vector.load %arg16[%c0_10, %c0_11] : memref<1x128xf32, #tpu.memory_space<vmem>>, vector<1x128xf32>
    %28 = arith.mulf %23, %27 : vector<1x128xf32>
    %cst_12 = arith.constant dense<0.000000e+00> : vector<128xf32>
    %29 = vector.multi_reduction <add>, %26, %cst_12 [0] : vector<128x128xf32> to vector<128xf32>
    %30 = vector.shape_cast %29 : vector<128xf32> to vector<1x128xf32>
    %31 = arith.addf %28, %30 : vector<1x128xf32>
    %c0_13 = arith.constant 0 : index
    %c0_14 = arith.constant 0 : index
    %32 = vector.load %arg16[%c0_13, %c0_14] : memref<1x128xf32, #tpu.memory_space<vmem>>, vector<1x128xf32>
    tpu.vector_store %arg16[%c0_13, %c0_14], %31 {strides = array<i32>} : memref<1x128xf32, #tpu.memory_space<vmem>>, vector<1x128xf32>,
    %c0_15 = arith.constant 0 : index
    %c0_16 = arith.constant 0 : index
    %33 = vector.load %arg17[%c0_15, %c0_16] : memref<32x128xf32, #tpu.memory_space<vmem>>, vector<32x128xf32>
    %34 = vector.broadcast %23 : vector<1x128xf32> to vector<32x128xf32>
    %35 = arith.mulf %34, %33 : vector<32x128xf32>
    %c0_17 = arith.constant 0 : index
    %c0_18 = arith.constant 0 : index
    %c0_19 = arith.constant 0 : index
    %36 = vector.load %arg5[%c0_17, %c0_18, %c0_19] : memref<1x32x128xbf16, #tpu.memory_space<vmem>>, vector<1x32x128xbf16>
    %37 = vector.shape_cast %36 : vector<1x32x128xbf16> to vector<32x128xbf16>
    %38 = arith.truncf %26 : vector<128x128xf32> to vector<128x128xbf16>
    %cst_20 = arith.constant dense<0.000000e+00> : vector<32x128xf32>
    %39 = tpu.matmul %37, %38, %cst_20 {dimension_numbers = #tpu.dot_dimension_numbers<[1], [0], [0], [1], [0, 0, 1, 1], [], []>} : vector<32x128xbf16>, vector<128x128xbf16>, vector<32x128xf32> -> vector<32x128xf32>
    %40 = arith.addf %35, %39 : vector<32x128xf32>
    %c0_21 = arith.constant 0 : index
    %c0_22 = arith.constant 0 : index
    %41 = vector.load %arg17[%c0_21, %c0_22] : memref<32x128xf32, #tpu.memory_space<vmem>>, vector<32x128xf32>
    tpu.vector_store %arg17[%c0_21, %c0_22], %40 {strides = array<i32>} : memref<32x128xf32, #tpu.memory_space<vmem>>, vector<32x128xf32>,
    %c0_23 = arith.constant 0 : index
    %c0_24 = arith.constant 0 : index
    %42 = vector.load %arg15[%c0_23, %c0_24] : memref<1x128xf32, #tpu.memory_space<vmem>>, vector<1x128xf32>
    tpu.vector_store %arg15[%c0_23, %c0_24], %21 {strides = array<i32>} : memref<1x128xf32, #tpu.memory_space<vmem>>, vector<1x128xf32>,
    %c0_i32_25 = arith.constant 0 : i32
    %43 = arith.cmpi eq, %arg2, %c0_i32_25 : i32
    %44 = arith.extui %43 : i1 to i32
    %c0_i32_26 = arith.constant 0 : i32
    %45 = arith.cmpi ne, %44, %c0_i32_26 : i32
    scf.if %45 {
      %c0_27 = arith.constant 0 : index
      %c0_28 = arith.constant 0 : index
      %46 = vector.load %arg16[%c0_27, %c0_28] : memref<1x128xf32, #tpu.memory_space<vmem>>, vector<1x128xf32>
      %cst_29 = arith.constant 1.000000e+00 : f32
      %47 = vector.broadcast %cst_29 : f32 to vector<1x128xf32>
      %48 = arith.divf %47, %46 : vector<1x128xf32>
      %c0_30 = arith.constant 0 : index
      %c0_31 = arith.constant 0 : index
      %49 = vector.load %arg17[%c0_30, %c0_31] : memref<32x128xf32, #tpu.memory_space<vmem>>, vector<32x128xf32>
      %50 = vector.broadcast %48 : vector<1x128xf32> to vector<32x128xf32>
      %51 = arith.mulf %49, %50 : vector<32x128xf32>
      %c0_32 = arith.constant 0 : index
      %c0_33 = arith.constant 0 : index
      %52 = vector.load %arg19[%c0_32, %c0_33] : memref<32x128xbf16, #tpu.memory_space<vmem>>, vector<32x128xbf16>
      %53 = arith.extf %52 : vector<32x128xbf16> to vector<32x128xf32>
      %54 = arith.addf %53, %51 : vector<32x128xf32>
      %cst_34 = arith.constant dense<0.000000e+00> : vector<128xf32>
      %55 = vector.multi_reduction <add>, %54, %cst_34 [0] : vector<32x128xf32> to vector<128xf32>
      %56 = vector.shape_cast %55 : vector<128xf32> to vector<1x128xf32>
      %cst_35 = arith.constant 3.200000e+01 : f32
      %57 = vector.broadcast %cst_35 : f32 to vector<1x128xf32>
      %58 = arith.divf %56, %57 : vector<1x128xf32>
      %59 = vector.broadcast %58 : vector<1x128xf32> to vector<32x128xf32>
      %60 = arith.subf %54, %59 : vector<32x128xf32>
      %61 = arith.mulf %60, %60 : vector<32x128xf32>
      %cst_36 = arith.constant dense<0.000000e+00> : vector<128xf32>
      %62 = vector.multi_reduction <add>, %61, %cst_36 [0] : vector<32x128xf32> to vector<128xf32>
      %63 = vector.shape_cast %62 : vector<128xf32> to vector<1x128xf32>
      %cst_37 = arith.constant 3.200000e+01 : f32
      %64 = vector.broadcast %cst_37 : f32 to vector<1x128xf32>
      %65 = arith.divf %63, %64 : vector<1x128xf32>
      %cst_38 = arith.constant 9.99999974E-6 : f32
      %66 = vector.broadcast %cst_38 : f32 to vector<1x128xf32>
      %67 = arith.addf %65, %66 : vector<1x128xf32>
      %68 = math.rsqrt %67 : vector<1x128xf32>
      %69 = vector.broadcast %68 : vector<1x128xf32> to vector<32x128xf32>
      %70 = arith.mulf %60, %69 : vector<32x128xf32>
      %c0_39 = arith.constant 0 : index
      %c0_40 = arith.constant 0 : index
      %71 = vector.load %arg8[%c0_39, %c0_40] : memref<32x1xf32, #tpu.memory_space<vmem>>, vector<32x1xf32>
      %72 = vector.broadcast %71 : vector<32x1xf32> to vector<32x128xf32>
      %73 = arith.mulf %70, %72 : vector<32x128xf32>
      %c0_41 = arith.constant 0 : index
      %c0_42 = arith.constant 0 : index
      %74 = vector.load %arg9[%c0_41, %c0_42] : memref<32x1xf32, #tpu.memory_space<vmem>>, vector<32x1xf32>
      %75 = vector.broadcast %74 : vector<32x1xf32> to vector<32x128xf32>
      %76 = arith.addf %73, %75 : vector<32x128xf32>
      %c0_43 = arith.constant 0 : index
      %c0_44 = arith.constant 0 : index
      %77 = vector.load %arg10[%c0_43, %c0_44] : memref<32x32xbf16, #tpu.memory_space<vmem>>, vector<32x32xbf16>
      %78 = arith.truncf %76 : vector<32x128xf32> to vector<32x128xbf16>
      %cst_45 = arith.constant dense<0.000000e+00> : vector<32x128xf32>
      %79 = tpu.matmul %77, %78, %cst_45 {dimension_numbers = #tpu.dot_dimension_numbers<[1], [0], [0], [1], [0, 0, 1, 1], [], []>} : vector<32x32xbf16>, vector<32x128xbf16>, vector<32x128xf32> -> vector<32x128xf32>
      %c0_46 = arith.constant 0 : index
      %c0_47 = arith.constant 0 : index
      %80 = vector.load %arg11[%c0_46, %c0_47] : memref<32x1xf32, #tpu.memory_space<vmem>>, vector<32x1xf32>
      %81 = vector.broadcast %80 : vector<32x1xf32> to vector<32x128xf32>
      %82 = arith.addf %79, %81 : vector<32x128xf32>
      %cst_48 = arith.constant 5.000000e-01 : f32
      %83 = vector.broadcast %cst_48 : f32 to vector<32x128xf32>
      %84 = arith.mulf %83, %82 : vector<32x128xf32>
      %cst_49 = arith.constant 0.707106769 : f32
      %85 = vector.broadcast %cst_49 : f32 to vector<32x128xf32>
      %86 = arith.mulf %82, %85 : vector<32x128xf32>
      %87 = math.erf %86 : vector<32x128xf32>
      %cst_50 = arith.constant 1.000000e+00 : f32
      %88 = vector.broadcast %cst_50 : f32 to vector<32x128xf32>
      %89 = arith.addf %88, %87 : vector<32x128xf32>
      %90 = arith.mulf %84, %89 : vector<32x128xf32>
      %c0_51 = arith.constant 0 : index
      %c0_52 = arith.constant 0 : index
      %91 = vector.load %arg12[%c0_51, %c0_52] : memref<32x32xbf16, #tpu.memory_space<vmem>>, vector<32x32xbf16>
      %92 = arith.truncf %90 : vector<32x128xf32> to vector<32x128xbf16>
      %cst_53 = arith.constant dense<0.000000e+00> : vector<32x128xf32>
      %93 = tpu.matmul %91, %92, %cst_53 {dimension_numbers = #tpu.dot_dimension_numbers<[1], [0], [0], [1], [0, 0, 1, 1], [], []>} : vector<32x32xbf16>, vector<32x128xbf16>, vector<32x128xf32> -> vector<32x128xf32>
      %c0_54 = arith.constant 0 : index
      %c0_55 = arith.constant 0 : index
      %94 = vector.load %arg13[%c0_54, %c0_55] : memref<32x1xf32, #tpu.memory_space<vmem>>, vector<32x1xf32>
      %95 = vector.broadcast %94 : vector<32x1xf32> to vector<32x128xf32>
      %96 = arith.addf %93, %95 : vector<32x128xf32>
      %97 = arith.addf %54, %96 : vector<32x128xf32>
      %c0_56 = arith.constant 0 : index
      %c0_57 = arith.constant 0 : index
      %c0_58 = arith.constant 0 : index
      %98 = vector.load %arg14[%c0_56, %c0_57, %c0_58] : memref<1x32x128xf32, #tpu.memory_space<vmem>>, vector<1x32x128xf32>
      %99 = vector.shape_cast %98 : vector<1x32x128xf32> to vector<32x128xf32>
      %100 = vector.shape_cast %97 : vector<32x128xf32> to vector<1x32x128xf32>
      tpu.vector_store %arg14[%c0_56, %c0_57, %c0_58], %100 {strides = array<i32>} : memref<1x32x128xf32, #tpu.memory_space<vmem>>, vector<1x32x128xf32>,
    } else {
    }
    return
  }
  func.func @transform_0(%arg0: i32, %arg1: i32, %arg2: i32) -> (i32, i32, i32) {
    %c0_i32 = arith.constant 0 : i32
    %c0_i32_0 = arith.constant 0 : i32
    return %arg0, %c0_i32, %arg1 : i32, i32, i32
  }
  func.func @transform_1(%arg0: i32, %arg1: i32, %arg2: i32) -> (i32, i32, i32) {
    %c0_i32 = arith.constant 0 : i32
    %c0_i32_0 = arith.constant 0 : i32
    return %arg0, %c0_i32, %arg2 : i32, i32, i32
  }
  func.func @transform_2(%arg0: i32, %arg1: i32, %arg2: i32) -> (i32, i32, i32) {
    %c0_i32 = arith.constant 0 : i32
    %c0_i32_0 = arith.constant 0 : i32
    return %arg0, %c0_i32, %arg2 : i32, i32, i32
  }
  func.func @transform_3(%arg0: i32, %arg1: i32, %arg2: i32) -> (i32, i32) {
    %c0_i32 = arith.constant 0 : i32
    %c0_i32_0 = arith.constant 0 : i32
    %c0_i32_1 = arith.constant 0 : i32
    return %c0_i32, %c0_i32_0 : i32, i32
  }
  func.func @transform_4(%arg0: i32, %arg1: i32, %arg2: i32) -> (i32, i32) {
    %c0_i32 = arith.constant 0 : i32
    %c0_i32_0 = arith.constant 0 : i32
    %c0_i32_1 = arith.constant 0 : i32
    return %c0_i32, %c0_i32_0 : i32, i32
  }
  func.func @transform_5(%arg0: i32, %arg1: i32, %arg2: i32) -> (i32, i32) {
    %c0_i32 = arith.constant 0 : i32
    %c0_i32_0 = arith.constant 0 : i32
    %c0_i32_1 = arith.constant 0 : i32
    return %c0_i32, %c0_i32_0 : i32, i32
  }
  func.func @transform_6(%arg0: i32, %arg1: i32, %arg2: i32) -> (i32, i32) {
    %c0_i32 = arith.constant 0 : i32
    %c0_i32_0 = arith.constant 0 : i32
    %c0_i32_1 = arith.constant 0 : i32
    return %c0_i32, %c0_i32_0 : i32, i32
  }
  func.func @transform_7(%arg0: i32, %arg1: i32, %arg2: i32) -> (i32, i32) {
    %c0_i32 = arith.constant 0 : i32
    %c0_i32_0 = arith.constant 0 : i32
    %c0_i32_1 = arith.constant 0 : i32
    return %c0_i32, %c0_i32_0 : i32, i32
  }
  func.func @transform_8(%arg0: i32, %arg1: i32, %arg2: i32) -> (i32, i32) {
    %c0_i32 = arith.constant 0 : i32
    %c0_i32_0 = arith.constant 0 : i32
    %c0_i32_1 = arith.constant 0 : i32
    return %c0_i32, %c0_i32_0 : i32, i32
  }
  func.func @transform_9(%arg0: i32, %arg1: i32, %arg2: i32) -> (i32, i32) {
    %c0_i32 = arith.constant 0 : i32
    %c0_i32_0 = arith.constant 0 : i32
    %c0_i32_1 = arith.constant 0 : i32
    return %c0_i32, %c0_i32_0 : i32, i32
  }
  func.func @transform_10(%arg0: i32, %arg1: i32, %arg2: i32) -> (i32, i32) {
    %c0_i32 = arith.constant 0 : i32
    %c0_i32_0 = arith.constant 0 : i32
    %c0_i32_1 = arith.constant 0 : i32
    return %c0_i32, %c0_i32_0 : i32, i32
  }
  func.func @transform_11(%arg0: i32, %arg1: i32, %arg2: i32) -> (i32, i32, i32) {
    %c0_i32 = arith.constant 0 : i32
    %c0_i32_0 = arith.constant 0 : i32
    return %arg0, %c0_i32, %arg1 : i32, i32, i32
  }
}

</mosaic_0001>

<bundles_post_ra>
// kernel: tpu_custom_call.1
= control target key start
LH: loop header
LB: loop body
LE: loop exit
PB: predicated region body
PF: predicated region fallthrough
CT: control target
= control target key end

     0   :  { %s2130_s0 = inlined_call_operand.vmem [shape: bf16[2,32,128], index: 0, kind: input, shape index: {}]   ;;  %s2131_s1 = inlined_call_operand.vmem [shape: bf16[2,4,128], index: 1, kind: input, shape index: {}]   ;;  %s2132_s2 = inlined_call_operand.vmem [shape: bf16[2,32,128], index: 2, kind: input, shape index: {}]   ;;  %s2133_s3 = inlined_call_operand.vmem [shape: bf16[4,32], index: 3, kind: input, shape index: {}]   ;;  %s2134_s4 = inlined_call_operand.vmem [shape: f32[4,1], index: 4, kind: input, shape index: {}]   ;;  %s2135_s5 = inlined_call_operand.vmem [shape: f32[32,1], index: 5, kind: input, shape index: {}]   ;;  %s2136_s6 = inlined_call_operand.vmem [shape: f32[32,1], index: 6, kind: input, shape index: {}]   ;;  %s2137_s7 = inlined_call_operand.vmem [shape: bf16[32,32], index: 7, kind: input, shape index: {}]   ;;  %s2138_s8 = inlined_call_operand.vmem [shape: f32[32,1], index: 8, kind: input, shape index: {}]   ;;  %s2139_s9 = inlined_call_operand.vmem [shape: bf16[32,32], index: 9, kind: input, shape index: {}]   ;;  %s2140_s10 = inlined_call_operand.vmem [shape: f32[32,1], index: 10, kind: input, shape index: {}]   ;;  %s2141_s11 = inlined_call_operand.hbm [shape: f32[2,32,128], index: 11, kind: output, shape index: {}]  }
   0x1   :  { %2143 = sst [smem:[#allocation11_spill]] %s2134_s4 }
   0x2   :  { %16 = vsyncpa [#allocation8], 0 }
   0x3   :  { %18 = vsyncpa [#allocation8 + $0x1], 0  ;;  %s1779_s17 = smov 0   ;;  %s1781_s18 = smov 0  }
   0x4   :  { %s1783_s19 = smov 0   ;;  %s1785_s20 = smov 0  }
   0x5   :  { %s1787_s21 = smov 0   ;;  %s1789_s22 = smov 0  }
   0x6 LB: > { %s1463_s23 = sadd.s32 4294967295, %s1711_s22   ;;  %s1464_s24 = sadd.s32 4294967294, %s1711_s22   ;;  %s1711_s22 = sphi %s1789_s22, %s24_s22   ;;  %s1707_s21 = sphi %s1787_s21, %s2157_s21   ;;  %s1703_s20 = sphi %s1785_s20, %s2156_s20   ;;  %s1699_s19 = sphi %s1783_s19, %s2155_s19   ;;  %s1695_s18 = sphi %s1781_s18, %s2154_s18   ;;  %s1691_s17 = sphi %s1779_s17, %s2153_s17  }
   0x7   : > { %s43_s25 = sadd.s32 1, %s1707_s21  ;;  %s304_s26 = sadd.s32 1, %s1699_s19 }
   0x8   : > { %p45_p0 = scmp.ge.s32.totalorder %s43_s25, 2  ;;  %p314_p1 = scmp.ne.s32.totalorder %s1699_s19, %s1695_s18 }
   0x9   : > { %p315_p2 = scmp.eq.s32.totalorder %s1463_s23, 1  ;;  %p320_p3 = scmp.ne.s32.totalorder %s1695_s18, %s1691_s17 }
   0xa   : > { %s2159_s25 = smov (%p45_p0, %s43_s25), 0  ;;  %p321_p5 = scmp.eq.s32.totalorder %s1464_s24, 1 }
   0xb   : > { %2144 = sst [smem:[#allocation10_spill]] %s2159_s25  ;;  %p1819_p4 = por %p315_p2, %p314_p1 }
   0xc   : > { %s299_s28 = ssub.s32 %s1707_s21, %s2159_s25  ;;  %p1467_p6 = scmp.ge.s32.totalorder %s1711_s22, 1 }
   0xd   : > { %p302_p7 = scmp.eq.s32.totalorder %s299_s28, 0  ;;  %p1826_p8 = por %p321_p5, %p320_p3 }
   0xe   : > { %p395_p9 = scmp.lt.s32.totalorder %s1711_s22, 3 }
   0xf   : > { %s1832_s30 = scalar_select %p302_p7, %s1699_s19, %s304_s26  }
  0x10   : > { %p396_p10 = pnand %p1467_p6, %p395_p9 }
  0x11   : > { %s2147_s4 = sld [smem:[#allocation11_spill]] (!%p396_p10)  ;;  %p453_p11 = scmp.lt.s32.totalorder (!%p396_p10), %s1703_s20, 1 }
  0x12   : > { %399 = sbr.rel (%p396_p10) target bundleno = 1042 (0x412), region = 64  ;;  %s450_s23 = sand.u32 (!%p396_p10), 1, %s1695_s18  }
  0x17   : > { %v492_v0 = vld [vmem:[%s2147_s4] sm:$0xf]  ;;  %v1713_v1 = vmov 0   ;;  %s1839_s14 = scalar_select %p453_p11, %s1703_s20, 1  ;;  %vm510_vm0 = vcmask 261120   ;;  %vm584_vm1 = vcmask 1041408  }
  0x18   : > { %1610 = vset.pattern.permute.xlu0 %v1713_v1  ;;  %1611 = vset.pattern.permute.xlu1 %v1713_v1  ;;  %v487_v4 = vld [vmem:[%s2133_s3] sm:$0x3]  ;;  %vm559_vm2 = vcmask 31744   ;;  %v1714_v15 = vmov -inf   ;;  %v1715_v16 = vmov 0.0   ;;  %v963_v61 = vld [vmem:[%s2135_s5 + $0x10] sm:$0xff] }
  0x19   : > { %495 = vperm.xlu0 %1610, %v492_v0   ;;  %1612 = vset.pattern.permute.xlu2 %v1713_v1  ;;  %s1528_s15 = sshll.u32 %s1839_s14, 4  ;;  %s1471_s12 = sshll.u32 %s1839_s14, 1  ;;  %481 = vst [vmem:[#allocation2] sm:$0x1] %v1714_v15  ;;  %v1265_v18 = vld [vmem:[%s2140_s10] sm:$0xff]  ;;  %v991_v63 = vld [vmem:[%s2136_s6 + $0x10] sm:$0xff] }
  0x1a   : > { %s460_s24 = scalar_lea.vmem %s2130_s0, %s1528_s15  ;;  %s467_s25 = scalar_lea.vmem %s2131_s1, %s1471_s12  ;;  %482 = vst [vmem:[#allocation3] sm:$0x1] %v1715_v16  ;;  %977 = vperm.xlu1 %1611, %v963_v61   ;;  %1005 = vperm.xlu2 %1612, %v991_v63   ;;  %v962_v16 = vld [vmem:[%s2135_s5 + $0x8] sm:$0xff] }
  0x1b   : > { %v1531_v2 = vld [vmem:[%s460_s24 + $0x8] sm:$0xff]  ;;  %v1530_v3 = vld [vmem:[%s460_s24] sm:$0xff]  ;;  %s1468_s14 = sshll.u32 %s450_s23, 5  ;;  %s1333_s4 = scalar_lea.sflag [#allocation8], %s450_s23 }
  0x1c   : > { %520 = vmatpush.bf16.msra.mxu0 %v1531_v2  ;;  %v541_v5 = vld [vmem:[%s467_s25] sm:$0x3]  ;;  %s1880_s25 = scalar_lea.vmem %s2132_s2, %s1528_s15  ;;  %s452_s24 = scalar_lea.vmem [#allocation7], %s1468_s14 }
  0x1d   : > { %s1346_s12 = sshll.u32 %s452_s24, 4  ;;  %s1653_s15 = scalar_lea.hbm %s2141_s11, 64  ;;  %s1347_s12 = int_to_ptr.vmem [resolvable:$true] %s1346_s12 }
  0x20   : > { %521 = vmatpush.bf16.msra.mxu0 %v1530_v3  ;;  %v704_v37 = vld [vmem:[#allocation2] sm:$0x1] }
  0x23   : > { %1482 = vmatmul.msk.bf16.vlgmr.msra.gmra.mxu0 %vm510_vm0, %v487_v4  ;;  %v964_v4 = vld [vmem:[%s2135_s5 + $0x18] sm:$0xff] }
  0x24   : > { %982 = vperm.xlu1 %1611, %v964_v4  }
  0x3b   : > { %543 = vxpose.xlu0.c.b16.start.end [1/1] (short) %v541_v5, 128 }
  0x8b   : > { %v496_v6 = vpop.permute.xlu0 %495 }
  0xa0   : > { %v523_v7 = vpop.f32.mrf.mxu0 }
  0xa1   : > { %v524_v8 = vadd.f32 %v523_v7, %v496_v6  ;;  %v992_v7 = vld [vmem:[%s2136_s6 + $0x18] sm:$0xff] }
  0xa2   : > { %1010 = vperm.xlu2 %1612, %v992_v7  }
  0xa3   : > { %v527_v9 = vpack.c.bf16 %v524_v8, %v524_v8 }
  0xa5   : > { %528 = vst [vmem:[#allocation5] sm:$0x3] %v527_v9 }
  0xa8   : > { %v525_v10 = vpop.f32.mrf.mxu0 }
  0xaa   : > { %972 = vperm.xlu2 %1612, %v962_v16  }
  0xac   : > { %v542_v11 = vld [vmem:[#allocation5] sm:$0x3] }
  0xad   : > { %v586_v12 = vsel %vm584_vm1, %v542_v11, 0  ;;  %v1532_v11 = vld [vmem:[%s1880_s25] sm:$0xff] }
  0xae   : > { %595 = vmatpush.bf16.msra.mxu1 %v586_v12  ;;  %1548 = vmatpush.bf16.msra.mxu3 %v586_v12 }
  0xe7   : > { %v551_v13 = vpop.trf.xlu0 }
  0xe8   : > { %1483 = vmatmul.msk.bf16.vlgmr.msra.gmra.mxu1 %vm559_vm2, %v551_v13  ;;  %v961_v13 = vld [vmem:[%s2135_s5] sm:$0xff] }
  0xe9   : > { %967 = vperm.xlu1 %1611, %v961_v13  }
  0xf7   : > { %v552_v14 = vpop.trf.xlu0 }
  0xf8   : > { %1484 = vmatmul.msk.bf16.gmra.mxu1 %vm559_vm2, %v552_v14 }
 0x107   : > { %v553_v17 = vpop.trf.xlu0 }
 0x108   : > { %1485 = vmatmul.msk.bf16.gmra.mxu1 %vm559_vm2, %v553_v17 }
 0x117   : > { %v554_v19 = vpop.trf.xlu0 }
 0x118   : > { %1486 = vmatmul.msk.bf16.gmra.mxu1 %vm559_vm2, %v554_v19  ;;  %v781_v19 = vld [vmem:[#allocation3] sm:$0x1] }
 0x119   : > { %1271 = vperm.xlu0 %1610, %v1265_v18  }
 0x127   : > { %v555_v20 = vpop.trf.xlu0 }
 0x128   : > { %1487 = vmatmul.msk.bf16.gmra.mxu1 %vm559_vm2, %v555_v20 }
 0x137   : > { %v556_v21 = vpop.trf.xlu0 }
 0x138   : > { %1488 = vmatmul.msk.bf16.vlgmr.msra.gmra.mxu3 %vm559_vm2, %v556_v21  ;;  %v989_v21 = vld [vmem:[%s2136_s6] sm:$0xff] }
 0x139   : > { %995 = vperm.xlu1 %1611, %v989_v21  }
 0x147   : > { %v557_v22 = vpop.trf.xlu0 }
 0x148   : > { %1489 = vmatmul.msk.bf16.gmra.mxu3 %vm559_vm2, %v557_v22 }
 0x157   : > { %v558_v33 = vpop.trf.xlu0 }
 0x158   : > { %1490 = vmatmul.msk.bf16.gmra.mxu3 %vm559_vm2, %v558_v33  ;;  %v1266_v33 = vld [vmem:[%s2140_s10 + $0x8] sm:$0xff] }
 0x165   : > { %v597_v23 = vpop.f32.mrf.mxu1 }
 0x166   : > { %v705_v24 = vmax.f32 %v597_v23, -1e+30 }
 0x168   : > { %v709_v25 = vmax.f32 %v705_v24, -1e+30 }
 0x16a   : > { %v713_v26 = vmax.f32 %v709_v25, -1e+30  ;;  %v990_v25 = vld [vmem:[%s2136_s6 + $0x8] sm:$0xff] }
 0x16b   : > { %1000 = vperm.xlu2 %1612, %v990_v25  }
 0x16c   : > { %v717_v27 = vmax.f32 %v713_v26, -1e+30  ;;  %v533_v26 = vld [vmem:[%s1880_s25] sm:$0xff]  }
 0x16d   : > { %v599_v28 = vpop.f32.mrf.mxu1  ;;  %537 = vst [vmem:[#allocation6] sm:$0xff] %v533_v26  }
 0x16e   : > { %v719_v29 = vmax.f32 %v717_v27, -1e+30  ;;  %v1533_v27 = vld [vmem:[%s1880_s25 + $0x8] sm:$0xff]  ;;  %v1025_v28 = vld [vmem:[%s2138_s8 + $0x10] sm:$0xff] }
 0x16f   : > { %1039 = vperm.xlu1 %1611, %v1025_v28  }
 0x170   : > { %v720_v30 = vrot.slane %v719_v29, 4 }
 0x172   : > { %v721_v31 = vmax.f32 %v719_v29, %v720_v30  ;;  %v1026_v29 = vld [vmem:[%s2138_s8 + $0x18] sm:$0xff]  ;;  %v1023_v30 = vld [vmem:[%s2138_s8] sm:$0xff] }
 0x173   : > { %1044 = vperm.xlu2 %1612, %v1026_v29  }
 0x174   : > { %v722_v32 = vrot.slane %v721_v31, 2 }
 0x175   : > { %v602_v35 = vpop.f32.mrf.mxu1 }
 0x176   : > { %v723_v34 = vmax.f32 %v721_v31, %v722_v32  ;;  %v1024_v31 = vld [vmem:[%s2138_s8 + $0x8] sm:$0xff] }
 0x177   : > { %1029 = vperm.xlu1 %1611, %v1023_v30  }
 0x178   : > { %v724_v36 = vrot.slane %v723_v34, 1 }
 0x17a   : > { %v725_v38 = vmax.f32 %v723_v34, %v724_v36  ;;  %v1267_v34 = vld [vmem:[%s2140_s10 + $0x10] sm:$0xff]  ;;  %v1268_v36 = vld [vmem:[%s2140_s10 + $0x18] sm:$0xff] }
 0x17b   : > { %1034 = vperm.xlu2 %1612, %v1024_v31  }
 0x17c   : > { %v726_v39 = vmax.f32 %v704_v37, %v725_v38 }
 0x17d   : > { %v604_v41 = vpop.f32.mrf.mxu1 }
 0x17e   : > { %v731_v40 = vperm.slane %v726_v39, 0  ;;  %868 = vst [vmem:[#allocation2] sm:$0x1] %v726_v39  ;;  %v727_v3 = vsub.f32 %v704_v37, %v726_v39 }
 0x17f   : > { %1276 = vperm.xlu1 %1611, %v1266_v33  }
 0x180   : > { %v733_v42 = vsub.f32 %v597_v23, %v731_v40  ;;  %v734_v43 = vsub.f32 -1e+30, %v731_v40  ;;  %v728_v8 = vmul.f32 1.442695, %v727_v3 }
 0x182   : > { %v749_v44 = vmul.f32 1.442695, %v733_v42  ;;  %v751_v45 = vmul.f32 1.442695, %v734_v43  ;;  %v535_v43 = vld [vmem:[%s1880_s25 + $0x8] sm:$0xff]   ;;  %s1538_s25 = sshll.u32 %s1703_s20, 5 }
 0x183   : > { %1281 = vperm.xlu2 %1612, %v1267_v34   ;;  %539 = vst [vmem:[#allocation6 + $0x8] sm:$0xff] %v535_v43   ;;  %s1345_s28 = scalar_lea.hbm %s2141_s11, %s1538_s25 }
 0x184   : > { %1613 = vpow2.f32 %v749_v44  ;;  %s1348_s13 = sshll.u32 %s1345_s28, 4  ;;  %s1349_s13 = int_to_ptr.hbm [resolvable:$true] %s1348_s13 }
 0x185   : > { %1615 = vpow2.f32 %v751_v45  ;;  %v607_v46 = vpop.f32.mrf.mxu1  ;;  %s1647_s20 = sshra.s32 %s1349_s13, 4  ;;  %s1648_s20 = int_to_ptr.hbm [resolvable:$true] %s1647_s20 }
 0x186   : > { %1617 = vpow2.f32 %v728_v8  ;;  %s1649_s16 = scalar_lea.hbm %s1648_s20, 32  ;;  %p1654_p1 = scmp.lt.s32.totalorder %s1648_s20, %s2141_s11 }
 0x187   : > { %1286 = vperm.xlu1 %1611, %v1268_v36   ;;  %p1650_p12 = scmp.ne.s32.totalorder %s1648_s20, %s1649_s16  ;;  %p1655_p2 = scmp.lt.s32.totalorder %s1653_s15, %s1649_s16 }
 0x189   : > { %p1651_p13 = pnand %p1650_p12, %p1819_p4  ;;  %p1656_p3 = por %p1655_p2, %p1654_p1 }
 0x18a   : > { %v1614_v47 = vpop.eup %1613 }
 0x18b   : > { %v1616_v48 = vpop.eup %1615  ;;  %p1652_p0 = pneg %p1651_p13 }
 0x18c   : > { %v783_v49 = vadd.f32 %v1616_v48, %v1614_v47  ;;  %v822_v50 = vpack.c.bf16 %v1616_v48, %v1616_v48  ;;  %v821_v10 = vpack.c.bf16 %v1616_v48, %v1614_v47  ;;  %v1618_v18 = vpop.eup %1617 }
 0x18d   : > { %v609_v52 = vpop.f32.mrf.mxu1  ;;  %v782_v22 = vmul.f32 %v1618_v18, %v781_v19  ;;  %p1657_p5 = pnand %p1656_p3, %p1652_p0 }
 0x18e   : > { %v784_v51 = vadd.f32 %v1616_v48, %v783_v49  ;;  %841 = vmatpush.bf16.msra.mxu2 %v822_v50 }
 0x190   : > { %v785_v53 = vadd.f32 %v1616_v48, %v784_v51 }
 0x192   : > { %v786_v54 = vadd.f32 %v1616_v48, %v785_v53  ;;  %842 = vmatpush.bf16.msra.mxu2 %v822_v50  ;;  %v811_v53 = vperm.slane %v1618_v18, 0 }
 0x194   : > { %v787_v55 = vadd.f32 %v1616_v48, %v786_v54 }
 0x195   : > { %v612_v57 = vpop.f32.mrf.mxu1 }
 0x196   : > { %v788_v56 = vadd.f32 %v1616_v48, %v787_v55  ;;  %843 = vmatpush.bf16.msra.mxu2 %v822_v50  ;;  %v813_v57 = vmul.f32 0.0, %v811_v53 }
 0x198   : > { %v789_v58 = vadd.f32 %v1616_v48, %v788_v56 }
 0x19a   : > { %v790_v59 = vadd.f32 %v1616_v48, %v789_v58  ;;  %844 = vmatpush.bf16.msra.mxu2 %v822_v50 }
 0x19c   : > { %v791_v60 = vadd.f32 %v1616_v48, %v790_v59 }
 0x19d   : > { %v614_v0 = vpop.f32.mrf.mxu1 }
 0x19e   : > { %v792_v62 = vadd.f32 %v1616_v48, %v791_v60  ;;  %845 = vmatpush.bf16.msra.mxu2 %v822_v50  ;;  %v1716_v0 = vmov 32.0  }
 0x1a0   : > { %v793_v1 = vadd.f32 %v1616_v48, %v792_v62 }
 0x1a2   : > { %v794_v2 = vadd.f32 %v1616_v48, %v793_v1  ;;  %846 = vmatpush.bf16.msra.mxu2 %v822_v50  ;;  %v1540_v1 = vld [vmem:[#allocation6] sm:$0xff]  }
 0x1a3   : > { %v1542_v4 = vunpack.c.h.bf16 %v1540_v1 }
 0x1a4   : > { %v795_v5 = vadd.f32 %v1616_v48, %v794_v2  ;;  %v1547_v2 = vld [vmem:[#allocation6 + $0x8] sm:$0xff]  }
 0x1a5   : > { %v617_v32 = vpop.f32.mrf.mxu1  ;;  %v1545_v8 = vunpack.c.l.bf16 %v1547_v2 }
 0x1a6   : > { %v796_v6 = vadd.f32 %v1616_v48, %v795_v5  ;;  %847 = vmatpush.bf16.msra.mxu2 %v822_v50 }
 0x1a8   : > { %v797_v9 = vadd.f32 %v1616_v48, %v796_v6  ;;  %v1541_v6 = vunpack.c.l.bf16 %v1540_v1 }
 0x1aa   : > { %v798_v12 = vrot.slane %v797_v9, 4  ;;  %848 = vmatpush.bf16.msra.mxu2 %v821_v10 }
 0x1ac   : > { %v799_v14 = vadd.f32 %v798_v12, %v797_v9 }
 0x1ad   : > { %849 = vmatmul.bf16.vlgmr.msra.gmra.mxu2 %v1532_v11  ;;  %v619_v35 = vpop.f32.mrf.mxu1 }
 0x1ae   : > { %v800_v15 = vrot.slane %v799_v14, 2 }
 0x1b0   : > { %v801_v17 = vadd.f32 %v800_v15, %v799_v14  ;;  %v1546_v15 = vunpack.c.h.bf16 %v1547_v2 }
 0x1b2   : > { %v802_v20 = vrot.slane %v801_v17, 1 }
 0x1b4   : > { %v803_v23 = vadd.f32 %v802_v20, %v801_v17 }
 0x1b6   : > { %v804_v24 = vadd.f32 %v803_v23, %v782_v22 }
 0x1b8   : > { %805 = vst [vmem:[#allocation3] sm:$0x1] %v804_v24 }
 0x1bb   : > { %v622_v37 = vpop.f32.mrf.mxu3 }
 0x1bd   : > { %854 = vmatmul.bf16.gmra.mxu2 %v1533_v27 }
 0x1bf   : > { %v872_v44 = vld [vmem:[#allocation3] sm:$0x1] }
 0x1c0   : > { %1619 = vrcp.f32 %v872_v44  ;;  %v884_v51 = vand.u32 2147483648, %v872_v44  ;;  %vm878_vm4 = vweird.f32 %v872_v44  ;;  %v882_v54 = vand.u32 2147483647, %v872_v44 }
 0x1c1   : > { %1621 = vrcp.f32 %v1716_v0 }
 0x1c2   : > { %v885_v56 = vor.u32 1.1754944e-38, %v884_v51  ;;  %vm883_vm6 = vcmp.eq.f32.partialorder %v882_v54, 8.507059e+37 }
 0x1c3   : > { %v624_v38 = vpop.f32.mrf.mxu3 }
 0x1c6   : > { %v1620_v45 = vpop.eup %1619 }
 0x1c7   : > { %v874_v46 = vmul.f32 %v1620_v45, %v872_v44  ;;  %vm879_vm3 = vweird.f32 %v1620_v45  ;;  %v1622_v9 = vpop.eup %1621 }
 0x1c8   : > { %vm880_vm5 = vmor %vm878_vm4, %vm879_vm3  ;;  %v921_v16 = vmul.f32 32.0, %v1622_v9  ;;  %vm925_vm7 = vweird.f32 %v1622_v9 }
 0x1c9   : > { %v875_v47 = vsub.f32 1.0, %v874_v46 }
 0x1ca   : > { %v922_v21 = vsub.f32 1.0, %v921_v16 }
 0x1cb   : > { %v627_v39 = vpop.f32.mrf.mxu3  ;;  %v876_v49 = vmul.f32 %v1620_v45, %v875_v47 }
 0x1cc   : > { %v923_v24 = vmul.f32 %v1622_v9, %v922_v21  ;;  %v1534_v21 = vld [vmem:[%s2137_s7] sm:$0xff] }
 0x1cd   : > { %v877_v50 = vadd.f32 %v1620_v45, %v876_v49  ;;  %v978_v49 = vpop.permute.xlu1 %977 }
 0x1ce   : > { %v924_v27 = vadd.f32 %v1622_v9, %v923_v24 }
 0x1cf   : > { %v881_v55 = vsel %vm880_vm5, %v1620_v45, %v877_v50  ;;  %v1006_v50 = vpop.permute.xlu2 %1005 }
 0x1d0   : > { %v886_v58 = vsel %vm883_vm6, %v885_v56, %v881_v55  ;;  %v926_v30 = vsel %vm925_vm7, %v1622_v9, %v924_v27 }
 0x1d1   : > { %v893_v62 = vperm.slane %v886_v58, 0 }
 0x1d3   : > { %v629_v40 = vpop.f32.mrf.mxu3 }
 0x1d5   : > { %v983_v54 = vpop.permute.xlu1 %982 }
 0x1d7   : > { %v1011_v55 = vpop.permute.xlu2 %1010 }
 0x1db   : > { %v632_v41 = vpop.f32.mrf.mxu3 }
 0x1e3   : > { %v634_v42 = vpop.f32.mrf.mxu3 }
 0x230   : > { %v850_v48 = vpop.f32.mrf.mxu2 }
 0x231   : > { %v860_v61 = vadd.f32 %v850_v48, %v813_v57 }
 0x233   : > { %v895_v5 = vmul.f32 %v893_v62, %v860_v61  ;;  %v968_v61 = vpop.permute.xlu1 %967 }
 0x235   : > { %v1924_v12 = vadd.f32 %v1541_v6, %v895_v5 }
 0x238   : > { %v852_v52 = vpop.f32.mrf.mxu2 }
 0x239   : > { %v861_v59 = vadd.f32 %v852_v52, %v813_v57 }
 0x23b   : > { %v896_v3 = vmul.f32 %v893_v62, %v861_v59 }
 0x23d   : > { %v1922_v10 = vadd.f32 %v1542_v4, %v896_v3 }
 0x23f   : > { %v911_v17 = vadd.f32 %v1922_v10, %v1924_v12 }
 0x240   : > { %v855_v60 = vpop.f32.mrf.mxu2 }
 0x241   : > { %v862_v63 = vadd.f32 %v855_v60, %v813_v57 }
 0x243   : > { %v897_v7 = vmul.f32 %v893_v62, %v862_v63 }
 0x245   : > { %v1926_v13 = vadd.f32 %v1545_v8, %v897_v7 }
 0x247   : > { %v912_v19 = vadd.f32 %v911_v17, %v1926_v13 }
 0x248   : > { %v857_v11 = vpop.f32.mrf.mxu2 }
 0x249   : > { %v863_v14 = vadd.f32 %v857_v11, %v813_v57 }
 0x24b   : > { %v898_v18 = vmul.f32 %v893_v62, %v863_v14  ;;  %v973_v62 = vpop.permute.xlu2 %972  ;;  %v996_v14 = vpop.permute.xlu1 %995 }
 0x24d   : > { %v1931_v20 = vadd.f32 %v1546_v15, %v898_v18 }
 0x24f   : > { %v913_v22 = vadd.f32 %v912_v19, %v1931_v20 }
 0x251   : > { %v914_v23 = vrot.slane %v913_v22, 4 }
 0x253   : > { %v915_v25 = vadd.f32 %v914_v23, %v913_v22  ;;  %v1001_v15 = vpop.permute.xlu2 %1000  ;;  %v1535_v22 = vld [vmem:[%s2137_s7 + $0x8] sm:$0xff]  ;;  %v1040_v23 = vpop.permute.xlu1 %1039 }
 0x255   : > { %v916_v26 = vrot.slane %v915_v25, 2 }
 0x257   : > { %v917_v28 = vadd.f32 %v916_v26, %v915_v25 }
 0x259   : > { %v918_v29 = vrot.slane %v917_v28, 1 }
 0x25b   : > { %v919_v31 = vadd.f32 %v918_v29, %v917_v28  ;;  %v1045_v24 = vpop.permute.xlu2 %1044  ;;  %v1030_v25 = vpop.permute.xlu1 %1029 }
 0x25d   : > { %v927_v32 = vmul.f32 %v926_v30, %v919_v31 }
 0x25f   : > { %v928_v33 = vsub.f32 %v1924_v12, %v927_v32  ;;  %v929_v34 = vsub.f32 %v1922_v10, %v927_v32  ;;  %v930_v35 = vsub.f32 %v1926_v13, %v927_v32  ;;  %v931_v36 = vsub.f32 %v1931_v20, %v927_v32 }
 0x261   : > { %v932_v37 = vmul.f32 %v928_v33, %v928_v33  ;;  %v933_v38 = vmul.f32 %v929_v34, %v929_v34  ;;  %v934_v39 = vmul.f32 %v930_v35, %v930_v35  ;;  %v935_v41 = vmul.f32 %v931_v36, %v931_v36 }
 0x263   : > { %v936_v40 = vadd.f32 %v933_v38, %v932_v37  ;;  %v1035_v31 = vpop.permute.xlu2 %1034 }
 0x265   : > { %v937_v42 = vadd.f32 %v936_v40, %v934_v39 }
 0x267   : > { %v938_v43 = vadd.f32 %v937_v42, %v935_v41 }
 0x269   : > { %v939_v44 = vrot.slane %v938_v43, 4 }
 0x26b   : > { %v940_v45 = vadd.f32 %v939_v44, %v938_v43 }
 0x26d   : > { %v941_v46 = vrot.slane %v940_v45, 2 }
 0x26f   : > { %v942_v47 = vadd.f32 %v941_v46, %v940_v45 }
 0x271   : > { %v943_v48 = vrot.slane %v942_v47, 1 }
 0x273   : > { %v944_v51 = vadd.f32 %v943_v48, %v942_v47 }
 0x275   : > { %v945_v52 = vmul.f32 %v944_v51, %v926_v30 }
 0x277   : > { %v946_v53 = vadd.f32 1e-05, %v945_v52 }
 0x279   : > { %1623 = vrsqrt.f32 %v946_v53  ;;  %vm953_vm9 = vweird.f32 %v946_v53 }
 0x27f   : > { %v1624_v56 = vpop.eup %1623 }
 0x280   : > { %v948_v57 = vmul.f32 %v1624_v56, %v946_v53  ;;  %vm954_vm8 = vweird.f32 %v1624_v56 }
 0x281   : > { %vm955_vm10 = vmor %vm953_vm9, %vm954_vm8 }
 0x282   : > { %v949_v58 = vmul.f32 %v1624_v56, %v948_v57 }
 0x284   : > { %v950_v59 = vmul.f32 0.5, %v949_v58 }
 0x286   : > { %v951_v60 = vsub.f32 1.5, %v950_v59 }
 0x288   : > { %v952_v63 = vmul.f32 %v1624_v56, %v951_v60 }
 0x28a   : > { %v956_v0 = vsel %vm955_vm10, %v1624_v56, %v952_v63 }
 0x28b   : > { %v959_v1 = vmul.f32 %v956_v0, %v930_v35  ;;  %v960_v2 = vmul.f32 %v956_v0, %v931_v36  ;;  %v957_v3 = vmul.f32 %v956_v0, %v928_v33  ;;  %v958_v4 = vmul.f32 %v956_v0, %v929_v34 }
 0x28d   : > { %v987_v5 = vmul.f32 %v978_v49, %v959_v1  ;;  %v988_v6 = vmul.f32 %v983_v54, %v960_v2  ;;  %v985_v7 = vmul.f32 %v968_v61, %v957_v3  ;;  %v986_v8 = vmul.f32 %v973_v62, %v958_v4 }
 0x28f   : > { %v1015_v9 = vadd.f32 %v1006_v50, %v987_v5  ;;  %v1016_v11 = vadd.f32 %v1011_v55, %v988_v6  ;;  %v1013_v16 = vadd.f32 %v996_v14, %v985_v7  ;;  %v1014_v17 = vadd.f32 %v1001_v15, %v986_v8 }
 0x291   : > { %v1022_v18 = vpack.c.bf16 %v1016_v11, %v1015_v9  ;;  %v1021_v19 = vpack.c.bf16 %v1014_v17, %v1013_v16 }
 0x293   : > { %1070 = vmatpush.bf16.msrb.mxu3 %v1022_v18 }
 0x297   : > { %1071 = vmatpush.bf16.msrb.mxu3 %v1021_v19 }
 0x29a   : > { %1507 = vmatmul.msk.bf16.vlgmr.msrb.gmra.mxu3 %vm510_vm0, %v1534_v21 }
 0x2aa   : > { %1508 = vmatmul.msk.bf16.gmra.mxu3 %vm510_vm0, %v1535_v22 }
 0x31d   : > { %v1073_v26 = vpop.f32.mrf.mxu3 }
 0x31e   : > { %v1946_v27 = vadd.f32 %v1073_v26, %v1030_v25 }
 0x320   : > { %v1949_v28 = vmul.f32 0.70710677, %v1946_v27 }
 0x322   : > { %v1091_v29 = vmul.f32 %v1949_v28, %v1949_v28 }
 0x324   : > { %v1953_v30 = vmin.f32 %v1091_v29, 16.0 }
 0x325   : > { %v1075_v32 = vpop.f32.mrf.mxu3 }
 0x326   : > { %v1955_v33 = vadd.f32 %v1075_v32, %v1035_v31  ;;  %v1104_v34 = vmul.f32 3.8918573e-05, %v1953_v30  ;;  %v1093_v51 = vmul.f32 2.1237322e-06, %v1953_v30 }
 0x328   : > { %v1959_v35 = vmul.f32 0.70710677, %v1955_v33  ;;  %v1105_v36 = vadd.f32 0.001143296, %v1104_v34  ;;  %v1094_v61 = vadd.f32 0.00028619796, %v1093_v51 }
 0x32a   : > { %v1131_v37 = vmul.f32 %v1959_v35, %v1959_v35  ;;  %v1106_v38 = vmul.f32 %v1105_v36, %v1953_v30  ;;  %v1095_v6 = vmul.f32 %v1094_v61, %v1953_v30 }
 0x32c   : > { %v1964_v39 = vmin.f32 %v1131_v37, 16.0  ;;  %v1107_v41 = vadd.f32 0.014752088, %v1106_v38  ;;  %v1096_v19 = vadd.f32 0.0036580483, %v1095_v6 }
 0x32d   : > { %v1078_v40 = vpop.f32.mrf.mxu3 }
 0x32e   : > { %v1966_v42 = vadd.f32 %v1078_v40, %v1040_v23  ;;  %v1144_v43 = vmul.f32 3.8918573e-05, %v1964_v39  ;;  %v1108_v44 = vmul.f32 %v1107_v41, %v1953_v30  ;;  %v1133_v52 = vmul.f32 2.1237322e-06, %v1964_v39 }
 0x32f   : > { %v1097_v34 = vmul.f32 %v1096_v19, %v1953_v30 }
 0x330   : > { %v1971_v45 = vmul.f32 0.70710677, %v1966_v42  ;;  %v1109_v46 = vadd.f32 0.112945676, %v1108_v44  ;;  %v1145_v47 = vadd.f32 0.001143296, %v1144_v43 }
 0x331   : > { %v1134_v62 = vadd.f32 0.00028619796, %v1133_v52 }
 0x332   : > { %v1171_v48 = vmul.f32 %v1971_v45, %v1971_v45  ;;  %v1110_v49 = vmul.f32 %v1109_v46, %v1953_v30  ;;  %v1146_v50 = vmul.f32 %v1145_v47, %v1964_v39 }
 0x333   : > { %v1135_v7 = vmul.f32 %v1134_v62, %v1964_v39 }
 0x334   : > { %v1979_v53 = vmin.f32 %v1171_v48, 16.0  ;;  %v1147_v55 = vadd.f32 0.014752088, %v1146_v50  ;;  %v1111_v57 = vadd.f32 0.4994258, %v1110_v49 }
 0x335   : > { %v1080_v54 = vpop.f32.mrf.mxu3  ;;  %v1136_v21 = vadd.f32 0.0036580483, %v1135_v7  ;;  %v1098_v48 = vadd.f32 0.05243302, %v1097_v34 }
 0x336   : > { %v1981_v56 = vadd.f32 %v1080_v54, %v1045_v24  ;;  %v1173_v58 = vmul.f32 2.1237322e-06, %v1979_v53  ;;  %v1184_v59 = vmul.f32 3.8918573e-05, %v1979_v53  ;;  %v1148_v60 = vmul.f32 %v1147_v55, %v1964_v39 }
 0x337   : > { %v1112_v2 = vmul.f32 %v1111_v57, %v1953_v30  ;;  %v1137_v38 = vmul.f32 %v1136_v21, %v1964_v39 }
 0x338   : > { %v1174_v63 = vadd.f32 0.00028619796, %v1173_v58  ;;  %v1987_v0 = vmul.f32 0.70710677, %v1981_v56  ;;  %v1185_v1 = vadd.f32 0.001143296, %v1184_v59  ;;  %v1099_v59 = vmul.f32 %v1098_v48, %v1953_v30 }
 0x339   : > { %v1149_v3 = vadd.f32 0.112945676, %v1148_v60  ;;  %v1998_v14 = vadd.f32 1.0, %v1112_v2  ;;  %v1138_v50 = vadd.f32 0.05243302, %v1137_v38 }
 0x33a   : > { %v1211_v4 = vmul.f32 %v1987_v0, %v1987_v0  ;;  %v1186_v5 = vmul.f32 %v1185_v1, %v1979_v53  ;;  %v1175_v8 = vmul.f32 %v1174_v63, %v1979_v53 }
 0x33b   : > { %v1150_v15 = vmul.f32 %v1149_v3, %v1964_v39  ;;  %1625 = vrcp.f32 %v1998_v14  ;;  %v1139_v61 = vmul.f32 %v1138_v50, %v1964_v39  ;;  %vm1119_vm11 = vweird.f32 %v1998_v14 }
 0x33c   : > { %v1996_v9 = vmin.f32 %v1211_v4, 16.0  ;;  %v1187_v11 = vadd.f32 0.014752088, %v1186_v5  ;;  %v1176_v23 = vadd.f32 0.0036580483, %v1175_v8 }
 0x33d   : > { %v1151_v22 = vadd.f32 0.4994258, %v1150_v15  ;;  %v1100_v5 = vadd.f32 0.18741608, %v1099_v59  ;;  %v1140_v8 = vadd.f32 0.18741608, %v1139_v61 }
 0x33e   : > { %v1213_v16 = vmul.f32 2.1237322e-06, %v1996_v9  ;;  %v1188_v17 = vmul.f32 %v1187_v11, %v1979_v53  ;;  %v1224_v18 = vmul.f32 3.8918573e-05, %v1996_v9  ;;  %v1177_v40 = vmul.f32 %v1176_v23, %v1979_v53 }
 0x33f   : > { %v1152_v29 = vmul.f32 %v1151_v22, %v1964_v39  ;;  %v1101_v21 = vmul.f32 %v1100_v5, %v1953_v30  ;;  %v1141_v23 = vmul.f32 %v1140_v8, %v1964_v39 }
 0x340   : > { %v1214_v24 = vadd.f32 0.00028619796, %v1213_v16  ;;  %v1189_v25 = vadd.f32 0.112945676, %v1188_v17  ;;  %v1225_v26 = vadd.f32 0.001143296, %v1224_v18 }
 0x341   : > { %v2010_v37 = vadd.f32 1.0, %v1152_v29  ;;  %v2016_v47 = vpop.eup %1625  ;;  %v1178_v51 = vadd.f32 0.05243302, %v1177_v40  ;;  %v1142_v40 = vadd.f32 1.1283791, %v1141_v23 }
 0x342   : > { %v1215_v31 = vmul.f32 %v1214_v24, %v1996_v9  ;;  %v1190_v32 = vmul.f32 %v1189_v25, %v1979_v53  ;;  %v1226_v36 = vmul.f32 %v1225_v26, %v1996_v9  ;;  %v1115_v57 = vmul.f32 %v2016_v47, %v1998_v14 }
 0x343   : > { %1627 = vrcp.f32 %v2010_v37  ;;  %v1179_v62 = vmul.f32 %v1178_v51, %v1979_v53  ;;  %vm1120_vm12 = vweird.f32 %v2016_v47  ;;  %v1123_v25 = vand.u32 2147483647, %v1998_v14 }
 0x344   : > { %v1191_v41 = vadd.f32 0.4994258, %v1190_v32  ;;  %v1216_v43 = vadd.f32 0.0036580483, %v1215_v31  ;;  %v1227_v44 = vadd.f32 0.014752088, %v1226_v36  ;;  %vm2048_vm1 = vmor %vm1119_vm11, %vm1120_vm12  ;;  %vm1159_vm3 = vweird.f32 %v2010_v37 }
 0x345   : > { %v1116_v3 = vsub.f32 1.0, %v1115_v57  ;;  %v1180_v11 = vadd.f32 0.18741608, %v1179_v62  ;;  %v1165_v38 = vand.u32 2147483648, %v2010_v37  ;;  %vm1124_vm6 = vcmp.eq.f32.partialorder %v1123_v25, 8.507059e+37 }
 0x346   : > { %v1192_v46 = vmul.f32 %v1191_v41, %v1979_v53  ;;  %v1228_v49 = vmul.f32 %v1227_v44, %v1996_v9  ;;  %v1217_v54 = vmul.f32 %v1216_v43, %v1996_v9  ;;  %v1163_v43 = vand.u32 2147483647, %v2010_v37 }
 0x347   : > { %v1117_v18 = vmul.f32 %v2016_v47, %v1116_v3  ;;  %v1181_v24 = vmul.f32 %v1180_v11, %v1979_v53  ;;  %v1125_v53 = vand.u32 2147483648, %v1998_v14  ;;  %v1143_v57 = vmul.f32 %v1142_v40, %v1959_v35 }
 0x348   : > { %v1193_v52 = vadd.f32 1.0, %v1192_v46  ;;  %v1229_v55 = vadd.f32 0.112945676, %v1228_v49  ;;  %v1218_v1 = vadd.f32 0.05243302, %v1217_v54  ;;  %vm1164_vm7 = vcmp.eq.f32.partialorder %v1163_v43, 8.507059e+37  ;;  %v1282_v43 = vpop.permute.xlu2 %1281 }
 0x349   : > { %v2022_v58 = vpop.eup %1627  ;;  %v1118_v30 = vadd.f32 %v2016_v47, %v1117_v18  ;;  %v1182_v41 = vadd.f32 1.1283791, %v1181_v24  ;;  %v1102_v46 = vadd.f32 1.1283791, %v1101_v21  ;;  %v1126_v54 = vor.u32 1.1754944e-38, %v1125_v53  ;;  %v1277_v53 = vpop.permute.xlu1 %1276 }
 0x34a   : > { %1629 = vrcp.f32 %v1193_v52  ;;  %v1230_v60 = vmul.f32 %v1229_v55, %v1996_v9  ;;  %v1155_v63 = vmul.f32 %v2022_v58, %v2010_v37  ;;  %v1219_v15 = vmul.f32 %v1218_v1, %v1996_v9 }
 0x34b   : > { %v1205_v31 = vand.u32 2147483648, %v1193_v52  ;;  %v1203_v32 = vand.u32 2147483647, %v1193_v52  ;;  %vm1160_vm14 = vweird.f32 %v2022_v58  ;;  %vm1199_vm15 = vweird.f32 %v1193_v52 }
 0x34c   : > { %v1231_v2 = vadd.f32 0.4994258, %v1230_v60  ;;  %v1156_v4 = vsub.f32 1.0, %v1155_v63  ;;  %v1220_v26 = vadd.f32 0.18741608, %v1219_v15  ;;  %vm2059_vm4 = vmor %vm1159_vm3, %vm1160_vm14  ;;  %v1166_v55 = vor.u32 1.1754944e-38, %v1165_v38 }
 0x34d   : > { %v1206_v50 = vor.u32 1.1754944e-38, %v1205_v31  ;;  %vm1204_vm5 = vcmp.eq.f32.partialorder %v1203_v32, 8.507059e+37  ;;  %v1183_v59 = vmul.f32 %v1182_v41, %v1971_v45  ;;  %v1103_v3 = vmul.f32 %v1102_v46, %v1949_v28 }
 0x34e   : > { %v1232_v6 = vmul.f32 %v1231_v2, %v1996_v9  ;;  %v1157_v19 = vmul.f32 %v2022_v58, %v1156_v4  ;;  %v1221_v48 = vmul.f32 %v1220_v26, %v1996_v9  ;;  %v1085_v28 = vmul.f32 0.5, %v1966_v42  ;;  %v1536_v42 = vld [vmem:[%s2139_s9] sm:$0xff] }
 0x34f   : > { %v1084_v24 = vmul.f32 0.5, %v1955_v33  ;;  %v1537_v33 = vld [vmem:[%s2139_s9 + $0x8] sm:$0xff] }
 0x350   : > { %v1630_v7 = vpop.eup %1629  ;;  %v2032_v17 = vadd.f32 1.0, %v1232_v6  ;;  %v1158_v34 = vadd.f32 %v2022_v58, %v1157_v19  ;;  %v1222_v61 = vadd.f32 1.1283791, %v1221_v48 }
 0x351   : > { %v1195_v16 = vmul.f32 %v1630_v7, %v1193_v52  ;;  %vm1200_vm13 = vweird.f32 %v1630_v7  ;;  %v1122_v52 = vsel %vm2048_vm1, %v2016_v47, %v1118_v30 }
 0x352   : > { %1631 = vrcp.f32 %v2032_v17  ;;  %vm1201_vm2 = vmor %vm1199_vm15, %vm1200_vm13  ;;  %v1162_v37 = vsel %vm2059_vm4, %v2022_v58, %v1158_v34  ;;  %v1245_v62 = vand.u32 2147483648, %v2032_v17  ;;  %v1127_v63 = vsel %vm1124_vm6, %v1126_v54, %v1122_v52 }
 0x353   : > { %v1196_v22 = vsub.f32 1.0, %v1195_v16  ;;  %v1167_v1 = vsel %vm1164_vm7, %v1166_v55, %v1162_v37  ;;  %v1243_v58 = vand.u32 2147483647, %v2032_v17  ;;  %vm1239_vm9 = vweird.f32 %v2032_v17 }
 0x354   : > { %v1168_v35 = vmul.f32 %v1167_v1, %v1143_v57  ;;  %v1246_v45 = vor.u32 1.1754944e-38, %v1245_v62  ;;  %v1128_v5 = vmul.f32 %v1127_v63, %v1103_v3  ;;  %v1223_v6 = vmul.f32 %v1222_v61, %v1987_v0 }
 0x355   : > { %v1197_v29 = vmul.f32 %v1630_v7, %v1196_v22  ;;  %vm1244_vm11 = vcmp.eq.f32.partialorder %v1243_v58, 8.507059e+37  ;;  %v1086_v22 = vmul.f32 0.5, %v1981_v56 }
 0x356   : > { %v1510_v16 = vclamps-f32 %v1168_v35, 1.0  ;;  %v1509_v21 = vclamps-f32 %v1128_v5, 1.0 }
 0x357   : > { %v1198_v36 = vadd.f32 %v1630_v7, %v1197_v29  ;;  %v1083_v29 = vmul.f32 0.5, %v1946_v27  ;;  %v1272_v27 = vpop.permute.xlu0 %1271 }
 0x358   : > { %v1632_v44 = vpop.eup %1631  ;;  %v1252_v23 = vadd.f32 1.0, %v1510_v16  ;;  %v1251_v26 = vadd.f32 1.0, %v1509_v21 }
 0x359   : > { %v1202_v49 = vsel %vm1201_vm2, %v1630_v7, %v1198_v36  ;;  %v1235_v14 = vmul.f32 %v1632_v44, %v2032_v17  ;;  %vm1240_vm8 = vweird.f32 %v1632_v44 }
 0x35a   : > { %v1207_v9 = vsel %vm1204_vm5, %v1206_v50, %v1202_v49  ;;  %vm1241_vm10 = vmor %vm1239_vm9, %vm1240_vm8  ;;  %v1256_v32 = vmul.f32 %v1252_v23, %v1084_v24  ;;  %v1255_v30 = vmul.f32 %v1251_v26, %v1083_v29 }
 0x35b   : > { %v1236_v60 = vsub.f32 1.0, %v1235_v14  ;;  %v1208_v47 = vmul.f32 %v1207_v9, %v1183_v59 }
 0x35c   : > { %v1263_v34 = vpack.c.bf16 %v1256_v32, %v1255_v30 }
 0x35d   : > { %v1237_v2 = vmul.f32 %v1632_v44, %v1236_v60  ;;  %v1511_v7 = vclamps-f32 %v1208_v47, 1.0 }
 0x35f   : > { %v1238_v4 = vadd.f32 %v1632_v44, %v1237_v2  ;;  %v1253_v19 = vadd.f32 1.0, %v1511_v7 }
 0x361   : > { %v1242_v8 = vsel %vm1241_vm10, %v1632_v44, %v1238_v4  ;;  %v1257_v25 = vmul.f32 %v1253_v19, %v1085_v28 }
 0x362   : > { %v1247_v11 = vsel %vm1244_vm11, %v1246_v45, %v1242_v8 }
 0x363   : > { %v1248_v15 = vmul.f32 %v1247_v11, %v1223_v6 }
 0x365   : > { %v1512_v18 = vclamps-f32 %v1248_v15, 1.0 }
 0x367   : > { %v1254_v17 = vadd.f32 1.0, %v1512_v18 }
 0x369   : > { %v1258_v0 = vmul.f32 %v1254_v17, %v1086_v22 }
 0x36b   : > { %v1264_v31 = vpack.c.bf16 %v1258_v0, %v1257_v25 }
 0x36d   : > { %1311 = vmatpush.bf16.msrb.mxu0 %v1264_v31 }
 0x371   : > { %1312 = vmatpush.bf16.msrb.mxu0 %v1263_v34 }
 0x374   : > { %1521 = vmatmul.msk.bf16.vlgmr.msrb.gmra.mxu0 %vm510_vm0, %v1536_v42 }
 0x384   : > { %1522 = vmatmul.msk.bf16.gmra.mxu0 %vm510_vm0, %v1537_v33 }
 0x3f1   : > { %v1314_v56 = vpop.f32.mrf.mxu0 }
 0x3f2   : > { %v1315_v36 = vadd.f32 %v1314_v56, %v1272_v27 }
 0x3f4   : > { %v1324_v39 = vadd.f32 %v1315_v36, %v1924_v12  ;;  %v1287_v12 = vpop.permute.xlu1 %1286 }
 0x3f6   : > { %1328 = vst [vmem:[%s452_s24] sm:$0xff] %v1324_v39 }
 0x3f9   : > { %v1316_v38 = vpop.f32.mrf.mxu0 }
 0x3fa   : > { %v1317_v40 = vadd.f32 %v1316_v38, %v1277_v53 }
 0x3fc   : > { %v1325_v41 = vadd.f32 %v1317_v40, %v1922_v10 }
 0x3fe   : > { %1329 = vst [vmem:[%s452_s24 + $0x8] sm:$0xff] %v1325_v41 }
 0x401   : > { %v1319_v44 = vpop.f32.mrf.mxu0 }
 0x402   : > { %v1320_v46 = vadd.f32 %v1319_v44, %v1282_v43 }
 0x404   : > { %v1326_v48 = vadd.f32 %v1320_v46, %v1926_v13 }
 0x406   : > { %1330 = vst [vmem:[%s452_s24 + $0x10] sm:$0xff] %v1326_v48 }
 0x409   : > { %v1321_v49 = vpop.f32.mrf.mxu0 }
 0x40a   : > { %v1322_v50 = vadd.f32 %v1321_v49, %v1287_v12 }
 0x40c   : > { %v1327_v10 = vadd.f32 %v1322_v50, %v1931_v20 }
 0x40e   : > { %1331 = vst [vmem:[%s452_s24 + $0x18] sm:$0xff] %v1327_v10 }
 0x40f   : > { %1660 = shalt.err (!%p1657_p5)
}
 0x410   : > { %s1717_s23 = smov 128   ;;  %s1718_s24 = smov 8  }
 0x411   : > { %1549 = dma.vmem_to_hbm [thread:$0]  (%p1819_p4), %s1347_s12, 512, %s1349_s13, %s1333_s4, %s1717_s23, %s1717_s23, %s1718_s24  }
 0x412 PF: > { %p1555_p6 = scmp.ge.s32.totalorder %s1711_s22, 2  ;;  %s1363_s14 = sand.u32 1, %s1691_s17  }
 0x413   : > { %s1364_s25 = scalar_lea.sflag [#allocation8], %s1363_s14 }
 0x414   : > { %p1552_p7 = pnand %p1555_p6, %p1826_p8 }
 0x416   : > { %p1553_p9 = pneg %p1552_p7 }
 0x418   : > { %1686 = dma.done.wait (%p1553_p9), %s1364_s25, 512  }
 0x419   : > { %1688 = vsyncadd (%p1553_p9), %s1364_s25, 4294966784  ;;  %s24_s22 = sadd.s32 1, %s1711_s22   ;;  %s2152_s27 = sld [smem:[#allocation10_spill]] }
 0x41a   : > { %p21_p10 = scmp.ge.s32.totalorder %s24_s22, 4   ;;  %s2153_s17 = smov %s1695_s18 }
 0x41b   : > { %s2154_s18 = smov %s1699_s19  ;;  %s2155_s19 = smov %s1832_s30 }
 0x41c   : > { %s2156_s20 = smov %s1707_s21  ;;  %23 = sbr.rel (!%p21_p10) target bundleno = 6 (0x6), region = 117 }
 0x41f   : > { %s2157_s21 = smov %s2152_s27 }
 0x421   :  { %1370 = vsyncpa [#allocation8], 1 }
 0x422   :  { %1372 = vsyncpa [#allocation8 + $0x1], 1 }

</bundles_post_ra>
